<compile_context>
chip_gen: v5e
topology: v5e:2x2
jax: 0.10.0
libtpu: 0.0.40
codegen_flags: <defaults>
</compile_context>

<pallas_src>
import functools

import jax
import jax.numpy as jnp
from jax.experimental import pallas as pl
from jax.experimental.pallas import tpu as pltpu


# ---------------- pass 1: fused conv (im2col matmul) + BN partial stats -----
def _conv_stats_kernel(x_ref, w_ref, y_ref, stats_ref, *, kh, kw, ow):
    # x_ref:     (1, HR, WR, C)    whole (space-to-depth'd) padded image for
    #                              this batch element; resident across strips.
    # w_ref:     (KH*KW*C, Cout)   im2col weight, resident across the grid.
    # y_ref:     (1, Cout, TH*OW)  lane-dense NCHW-flat output strip.
    # stats_ref: (1, 1, 2, Cout)   per-strip [channel sum; channel sum-of-sq].
    k = w_ref.shape[0]
    m = y_ref.shape[2]
    th = m // ow

    # First input row needed by this output strip.  Stride is always 1 here:
    # stride>1 convs are rewritten to stride-1 via space-to-depth in the
    # wrapper, so no strided ref slices are ever needed.
    h0 = pl.multiple_of(pl.program_id(1) * th, th)

    # im2col: gather every kernel tap once and concatenate along the channel
    # (lane) axis -> one big MXU contraction with K = kh*kw*C.
    # TODO(synk): for C not a multiple of 128 this concat does lane-shift
    # relayouts; pad C to 128 for production channel counts.
    taps = []
    for i in range(kh):                              # static unroll over taps
        for j in range(kw):
            taps.append(x_ref[0, pl.ds(h0 + i, th), pl.ds(j, ow), :])
    patch = jnp.concatenate(taps, axis=-1).reshape(th * ow, k)

    # Single MXU matmul, f32 accumulation (operands may be bf16).
    acc = jnp.dot(patch, w_ref[...], preferred_element_type=jnp.float32)

    # Fused BatchNorm partial statistics from the f32 accumulator, reduced
    # over the sublane (row) axis -> no cross-lane XLU reduction.
    ssum = jnp.sum(acc, axis=0, keepdims=True)           # (1, Cout)
    ssq = jnp.sum(acc * acc, axis=0, keepdims=True)      # (1, Cout)
    stats_ref[0, 0] = jnp.concatenate([ssum, ssq], axis=0)

    # Lane-dense NCHW-flat store (Cout < 128 here, so the transposed layout
    # keeps the minor dim lane-dense).
    # TODO(synk): for Cout >= 128 store (TH*OW, Cout) directly (no per-step
    # XLU transpose) and relayout in the BN-apply pass / keep NHWC end-to-end.
    y_ref[0] = acc.T.astype(y_ref.dtype)


# ---------------- pass 2: BatchNorm affine apply (elementwise) ---------------
def _bn_apply_kernel(y_ref, scale_ref, shift_ref, o_ref):
    # y_ref: (1, Cout, TS) lane-dense strip; scale/shift: (Cout, 1) resident.
    o_ref[...] = (y_ref[...].astype(jnp.float32) * scale_ref[...]
                  + shift_ref[...]).astype(o_ref.dtype)


# ----------------------------- tiling helpers --------------------------------
def _pick_h_tile(oh, ow, min_tiles=2, max_rows=256):
    """Largest OH strip dividing OH, a multiple of 8 sublanes, with TH*OW a
    multiple of 128 lanes and at least `min_tiles` grid steps.  Falls back to
    the full OH (block == full dims; perf-only: store may be lane-masked)."""
    best = oh
    for th in range(8, min(oh - 1, max_rows) + 1, 8):
        if oh % th == 0 and (th * ow) % 128 == 0 and oh // th >= min_tiles:
            best = th
    return best


def _pick_flat_tile(s, cap=2048):
    """Largest multiple-of-128 divisor of s (capped), else the full extent —
    fat lane-dense blocks so the elementwise BN pass runs near HBM roofline."""
    best = s
    for t in range(128, min(s, cap) + 1, 128):
        if s % t == 0:
            best = t
    return best


# ------------------------- stride>1 space-to-depth ---------------------------
def _space_to_depth(x_nhwc, oh, ow, kb_h, kb_w, stride):
    """(N, Hp, Wp, C) -> (N, OH+KBh-1, OW+KBw-1, s*s*C), channel order
    (ir, jr, c), so a stride-s conv becomes a stride-1 conv."""
    n, hp, wp, c = x_nhwc.shape
    hr, wr = oh + kb_h - 1, ow + kb_w - 1
    need_h, need_w = hr * stride, wr * stride
    pad_h, pad_w = max(0, need_h - hp), max(0, need_w - wp)
    if pad_h or pad_w:
        # Extra rows/cols are only read by zero-weight taps -> safe.
        x_nhwc = jnp.pad(x_nhwc, ((0, 0), (0, pad_h), (0, pad_w), (0, 0)))
    x_nhwc = x_nhwc[:, :need_h, :need_w, :]
    x_r = x_nhwc.reshape(n, hr, stride, wr, stride, c)
    x_r = jnp.transpose(x_r, (0, 1, 3, 2, 4, 5))
    return x_r.reshape(n, hr, wr, stride * stride * c)


def _im2col_weight(weight_oihw, stride, kb_h, kb_w):
    """OIHW -> (KBh*KBw*s*s*Cin, Cout), row order (ib, jb, ir, jr, ci) to
    match the kernel's tap-concat order (identity layout change at s=1)."""
    cout, cin, kh, kw = weight_oihw.shape
    wpad = jnp.pad(weight_oihw, ((0, 0), (0, 0),
                                 (0, kb_h * stride - kh),
                                 (0, kb_w * stride - kw)))
    wr = wpad.reshape(cout, cin, kb_h, stride, kb_w, stride)
    wr = jnp.transpose(wr, (2, 4, 3, 5, 1, 0))   # (ib, jb, ir, jr, ci, co)
    return wr.reshape(kb_h * kb_w * stride * stride * cin, cout)


# ------------------------------ wrapper --------------------------------------
def conv2d_forward(x_nchw, weight_oihw, gamma, beta, *, stride=1, padding=0,
                   use_norm=True, eps=1e-5, compute_dtype=jnp.float32):
    n, cin, h, w = x_nchw.shape
    cout, _, kh, kw = weight_oihw.shape
    out_dtype = x_nchw.dtype

    # Cast activations to the MXU compute dtype up front: halves the pad /
    # space-to-depth traffic and the resident VMEM image in the bf16 path.
    x = x_nchw.astype(compute_dtype)

    # NHWC so channels land on the lane axis of the im2col operand.
    # TODO(synk): keep activations NHWC end-to-end and pad in-kernel (masked
    # boundary taps) to drop this transpose + pad HBM round trip.
    x = jnp.transpose(x, (0, 2, 3, 1))
    if padding:
        x = jnp.pad(x, ((0, 0), (padding, padding), (padding, padding), (0, 0)))
    hp, wp = h + 2 * padding, w + 2 * padding
    oh = (hp - kh) // stride + 1
    ow = (wp - kw) // stride + 1

    # stride > 1: rewrite as a stride-1 conv via space-to-depth.  Removes all
    # strided ref indexing and raises K / effective Cin toward the MXU tile.
    kb_h, kb_w = -(-kh // stride), -(-kw // stride)
    if stride > 1:
        x = _space_to_depth(x, oh, ow, kb_h, kb_w, stride)
    _, hr, wr, c_eff = x.shape
    k_dim = kb_h * kb_w * c_eff

    w2 = _im2col_weight(weight_oihw, stride, kb_h, kb_w).astype(compute_dtype)

    th = _pick_h_tile(oh, ow)
    n_h = oh // th
    grid = (n, n_h)   # batch leading & parallel -> megacore shards distinct images

    # Intermediate conv-output dtype: bf16 when the MXU path is bf16 and a BN
    # pass will re-read it (stats already come from the f32 accumulator);
    # otherwise the model dtype.
    y1_dtype = (compute_dtype
                if (use_norm and compute_dtype == jnp.bfloat16) else out_dtype)

    conv_kern = functools.partial(_conv_stats_kernel, kh=kb_h, kw=kb_w, ow=ow)
    y_flat, stats = pl.pallas_call(
        conv_kern,
        out_shape=(
            jax.ShapeDtypeStruct((n, cout, oh * ow), y1_dtype),
            jax.ShapeDtypeStruct((n, n_h, 2, cout), jnp.float32),
        ),
        grid_spec=pltpu.PrefetchScalarGridSpec(
            num_scalar_prefetch=0,
            grid=grid,
            in_specs=[
                # Whole (reorganized) image per batch element, resident across
                # the strip axis.
                # TODO(synk): for production H*W switch this to
                # memory_space=pl.ANY with a manually double-buffered
                # halo-strip DMA (only TH+KH-1 rows in VMEM), or at least
                # pipeline_mode=pl.Buffered(1) on v7x's 64 MiB VMEM.
                pl.BlockSpec((1, hr, wr, c_eff), lambda i, j: (i, 0, 0, 0)),
                pl.BlockSpec((k_dim, cout), lambda i, j: (0, 0)),
            ],
            out_specs=(
                pl.BlockSpec((1, cout, th * ow), lambda i, j: (i, 0, j)),
                pl.BlockSpec((1, 1, 2, cout), lambda i, j: (i, j, 0, 0)),
            ),
        ),
        compiler_params=pltpu.CompilerParams(
            dimension_semantics=("parallel", "parallel"),
            vmem_limit_bytes=48 * 1024 * 1024,   # > v5e default, < v7x physical
        ),
    )(x, w2)

    if not use_norm:
        return y_flat.reshape(n, cout, oh, ow)   # already NCHW; free view

    # Training-mode BN: batch mean + biased variance from the fused partial
    # stats (tiny (N, n_h, 2, Cout) reduction outside the kernel).
    # NOTE: E[x^2]-E[x]^2 in f32 is cancellation-prone for very large
    # N*OH*OW / large-mean channels; use shifted accumulation if that bites.
    tot = jnp.sum(stats, axis=(0, 1))                    # (2, Cout)
    cnt = jnp.float32(n * oh * ow)
    mean = tot[0] / cnt
    var = tot[1] / cnt - mean * mean
    scale = gamma.astype(jnp.float32) * jax.lax.rsqrt(var + eps)
    shift = beta.astype(jnp.float32) - mean * scale
    # TODO(synk): nn.BatchNorm2d running_mean/running_var momentum updates
    # (training-time buffer side effect) are not reproduced here.

    # Pass 2: elementwise affine with its own fat lane-dense tiling; aliased
    # in place onto y when dtypes allow (no extra output allocation).
    ts = _pick_flat_tile(oh * ow)
    grid2 = (n, (oh * ow) // ts)
    alias = {0: 0} if y1_dtype == out_dtype else {}
    y_out = pl.pallas_call(
        _bn_apply_kernel,
        out_shape=jax.ShapeDtypeStruct((n, cout, oh * ow), out_dtype),
        grid_spec=pltpu.PrefetchScalarGridSpec(
            num_scalar_prefetch=0,
            grid=grid2,
            in_specs=[
                pl.BlockSpec((1, cout, ts), lambda i, j: (i, 0, j)),
                pl.BlockSpec((cout, 1), lambda i, j: (0, 0)),
                pl.BlockSpec((cout, 1), lambda i, j: (0, 0)),
            ],
            out_specs=pl.BlockSpec((1, cout, ts), lambda i, j: (i, 0, j)),
        ),
        input_output_aliases=alias,
        compiler_params=pltpu.CompilerParams(
            dimension_semantics=("parallel", "parallel")),
    )(y_flat, scale.reshape(cout, 1), shift.reshape(cout, 1))

    return y_out.reshape(n, cout, oh, ow)        # already NCHW; free view


# ----------------------------- reference -------------------------------------
def _reference(x, w, gamma, beta, *, stride, padding, use_norm, eps=1e-5):
    y = jax.lax.conv_general_dilated(
        x, w, window_strides=(stride, stride),
        padding=[(padding, padding), (padding, padding)],
        dimension_numbers=("NCHW", "OIHW", "NCHW"))
    if use_norm:
        mean = jnp.mean(y, axis=(0, 2, 3), keepdims=True)
        var = jnp.mean(jnp.square(y - mean), axis=(0, 2, 3), keepdims=True)
        y = (y - mean) * jax.lax.rsqrt(var + eps)
        y = y * gamma.reshape(1, -1, 1, 1) + beta.reshape(1, -1, 1, 1)
    return y


if __name__ == "__main__":
    # Module-consistent toy shapes: batch=2, Cin=4, H=W=16, Cout=8, k=3.
    N, Cin, H, W = 2, 4, 16, 16
    Cout, K = 8, 3

    key = jax.random.PRNGKey(0)
    kx, kw_, kg, kb = jax.random.split(key, 4)
    x = jax.random.normal(kx, (N, Cin, H, W), dtype=jnp.float32)
    weight = jax.random.normal(kw_, (Cout, Cin, K, K), dtype=jnp.float32) * 0.1
    gamma = jax.random.uniform(kg, (Cout,), jnp.float32, 0.5, 1.5)
    beta = jax.random.normal(kb, (Cout,), dtype=jnp.float32) * 0.1

    # Case 1: stride=1, padding=1, f32 everywhere (tight tolerance).
    out = conv2d_forward(x, weight, gamma, beta, stride=1, padding=1,
                         use_norm=True, compute_dtype=jnp.float32)
    out = jax.block_until_ready(out)
    ref = _reference(x, weight, gamma, beta, stride=1, padding=1, use_norm=True)
    assert out.shape == (N, Cout, H, W)
    assert jnp.allclose(out, ref, rtol=1e-4, atol=1e-4), "stride-1 f32 mismatch"

    # Case 2: stride=2 (space-to-depth path), bf16 MXU operands + bf16
    # conv-output intermediate.  Compare against a reference run on
    # bf16-rounded inputs so only kernel-introduced error remains.
    out2 = conv2d_forward(x, weight, gamma, beta, stride=2, padding=1,
                          use_norm=True, compute_dtype=jnp.bfloat16)
    out2 = jax.block_until_ready(out2)
    x_bf = x.astype(jnp.bfloat16).astype(jnp.float32)
    w_bf = weight.astype(jnp.bfloat16).astype(jnp.float32)
    ref2 = _reference(x_bf, w_bf, gamma, beta, stride=2, padding=1, use_norm=True)
    assert out2.shape == (N, Cout, 8, 8)
    assert jnp.allclose(out2, ref2, rtol=5e-2, atol=5e-2), "stride-2 bf16 mismatch"

    # Case 3: use_norm=False branch (conv only, output straight from pass 1).
    out3 = conv2d_forward(x, weight, gamma, beta, stride=1, padding=1,
                          use_norm=False, compute_dtype=jnp.float32)
    out3 = jax.block_until_ready(out3)
    ref3 = _reference(x, weight, gamma, beta, stride=1, padding=1, use_norm=False)
    assert out3.shape == (N, Cout, H, W)
    assert jnp.allclose(out3, ref3, rtol=1e-4, atol=1e-4), "no-norm mismatch"

    print("KERNEL_OK")
</pallas_src>

<mosaic_0001>
module attributes {stable_mosaic.version = 11 : i64} {
  func.func @_conv_stats_kernel(%arg0: i32, %arg1: i32, %arg2: memref<1x18x18x4xf32, #tpu.memory_space<vmem>>, %arg3: memref<36x8xf32, #tpu.memory_space<vmem>>, %arg4: memref<1x8x128xf32, #tpu.memory_space<vmem>>, %arg5: memref<1x1x2x8xf32, #tpu.memory_space<vmem>>) attributes {dimension_semantics = [#tpu.dimension_semantics<parallel>, #tpu.dimension_semantics<parallel>], iteration_bounds = array<i64: 2, 2>, scalar_prefetch = 0 : i64, scratch_operands = 0 : i64, tpu.core_type = #tpu.core_type<tc>, window_params = [{transform_indices = @transform_0, window_bounds = array<i64: 1, 18, 18, 4>}, {pipeline_mode = #tpu.pipeline_mode<synchronous>, transform_indices = @transform_1, window_bounds = array<i64: 36, 8>}, {transform_indices = @transform_2, window_bounds = array<i64: 1, 8, 128>}, {transform_indices = @transform_3, window_bounds = array<i64: 1, 1, 2, 8>}]} {
    %c8_i32 = arith.constant 8 : i32
    %0 = arith.muli %arg1, %c8_i32 : i32
    %1 = tpu.assume_multiple %0, 8 : i32
    %c0_i32 = arith.constant 0 : i32
    %2 = arith.addi %1, %c0_i32 : i32
    %c0 = arith.constant 0 : index
    %3 = arith.index_cast %2 : i32 to index
    %c0_0 = arith.constant 0 : index
    %c0_1 = arith.constant 0 : index
    %4 = vector.load %arg2[%c0, %3, %c0_0, %c0_1] : memref<1x18x18x4xf32, #tpu.memory_space<vmem>>, vector<1x8x16x4xf32>
    %5 = vector.shape_cast %4 : vector<1x8x16x4xf32> to vector<8x16x4xf32>
    %c0_i32_2 = arith.constant 0 : i32
    %6 = arith.addi %1, %c0_i32_2 : i32
    %c0_3 = arith.constant 0 : index
    %7 = arith.index_cast %6 : i32 to index
    %c1 = arith.constant 1 : index
    %c0_4 = arith.constant 0 : index
    %8 = vector.load %arg2[%c0_3, %7, %c1, %c0_4] : memref<1x18x18x4xf32, #tpu.memory_space<vmem>>, vector<1x8x16x4xf32>
    %9 = vector.shape_cast %8 : vector<1x8x16x4xf32> to vector<8x16x4xf32>
    %c0_i32_5 = arith.constant 0 : i32
    %10 = arith.addi %1, %c0_i32_5 : i32
    %c0_6 = arith.constant 0 : index
    %11 = arith.index_cast %10 : i32 to index
    %c2 = arith.constant 2 : index
    %c0_7 = arith.constant 0 : index
    %12 = vector.load %arg2[%c0_6, %11, %c2, %c0_7] : memref<1x18x18x4xf32, #tpu.memory_space<vmem>>, vector<1x8x16x4xf32>
    %13 = vector.shape_cast %12 : vector<1x8x16x4xf32> to vector<8x16x4xf32>
    %c1_i32 = arith.constant 1 : i32
    %14 = arith.addi %1, %c1_i32 : i32
    %c0_8 = arith.constant 0 : index
    %15 = arith.index_cast %14 : i32 to index
    %c0_9 = arith.constant 0 : index
    %c0_10 = arith.constant 0 : index
    %16 = vector.load %arg2[%c0_8, %15, %c0_9, %c0_10] : memref<1x18x18x4xf32, #tpu.memory_space<vmem>>, vector<1x8x16x4xf32>
    %17 = vector.shape_cast %16 : vector<1x8x16x4xf32> to vector<8x16x4xf32>
    %c1_i32_11 = arith.constant 1 : i32
    %18 = arith.addi %1, %c1_i32_11 : i32
    %c0_12 = arith.constant 0 : index
    %19 = arith.index_cast %18 : i32 to index
    %c1_13 = arith.constant 1 : index
    %c0_14 = arith.constant 0 : index
    %20 = vector.load %arg2[%c0_12, %19, %c1_13, %c0_14] : memref<1x18x18x4xf32, #tpu.memory_space<vmem>>, vector<1x8x16x4xf32>
    %21 = vector.shape_cast %20 : vector<1x8x16x4xf32> to vector<8x16x4xf32>
    %c1_i32_15 = arith.constant 1 : i32
    %22 = arith.addi %1, %c1_i32_15 : i32
    %c0_16 = arith.constant 0 : index
    %23 = arith.index_cast %22 : i32 to index
    %c2_17 = arith.constant 2 : index
    %c0_18 = arith.constant 0 : index
    %24 = vector.load %arg2[%c0_16, %23, %c2_17, %c0_18] : memref<1x18x18x4xf32, #tpu.memory_space<vmem>>, vector<1x8x16x4xf32>
    %25 = vector.shape_cast %24 : vector<1x8x16x4xf32> to vector<8x16x4xf32>
    %c2_i32 = arith.constant 2 : i32
    %26 = arith.addi %1, %c2_i32 : i32
    %c0_19 = arith.constant 0 : index
    %27 = arith.index_cast %26 : i32 to index
    %c0_20 = arith.constant 0 : index
    %c0_21 = arith.constant 0 : index
    %28 = vector.load %arg2[%c0_19, %27, %c0_20, %c0_21] : memref<1x18x18x4xf32, #tpu.memory_space<vmem>>, vector<1x8x16x4xf32>
    %29 = vector.shape_cast %28 : vector<1x8x16x4xf32> to vector<8x16x4xf32>
    %c2_i32_22 = arith.constant 2 : i32
    %30 = arith.addi %1, %c2_i32_22 : i32
    %c0_23 = arith.constant 0 : index
    %31 = arith.index_cast %30 : i32 to index
    %c1_24 = arith.constant 1 : index
    %c0_25 = arith.constant 0 : index
    %32 = vector.load %arg2[%c0_23, %31, %c1_24, %c0_25] : memref<1x18x18x4xf32, #tpu.memory_space<vmem>>, vector<1x8x16x4xf32>
    %33 = vector.shape_cast %32 : vector<1x8x16x4xf32> to vector<8x16x4xf32>
    %c2_i32_26 = arith.constant 2 : i32
    %34 = arith.addi %1, %c2_i32_26 : i32
    %c0_27 = arith.constant 0 : index
    %35 = arith.index_cast %34 : i32 to index
    %c2_28 = arith.constant 2 : index
    %c0_29 = arith.constant 0 : index
    %36 = vector.load %arg2[%c0_27, %35, %c2_28, %c0_29] : memref<1x18x18x4xf32, #tpu.memory_space<vmem>>, vector<1x8x16x4xf32>
    %37 = vector.shape_cast %36 : vector<1x8x16x4xf32> to vector<8x16x4xf32>
    %38 = tpu.concatenate %5, %9, %13, %17, %21, %25, %29, %33, %37 in 2 : vector<8x16x4xf32>, vector<8x16x4xf32>, vector<8x16x4xf32>, vector<8x16x4xf32>, vector<8x16x4xf32>, vector<8x16x4xf32>, vector<8x16x4xf32>, vector<8x16x4xf32>, vector<8x16x4xf32> -> vector<8x16x36xf32>
    %39 = vector.shape_cast %38 : vector<8x16x36xf32> to vector<128x36xf32>
    %c0_30 = arith.constant 0 : index
    %c0_31 = arith.constant 0 : index
    %40 = vector.load %arg3[%c0_30, %c0_31] : memref<36x8xf32, #tpu.memory_space<vmem>>, vector<36x8xf32>
    %cst = arith.constant dense<0.000000e+00> : vector<128x8xf32>
    %41 = tpu.matmul %39, %40, %cst {dimension_numbers = #tpu.dot_dimension_numbers<[1], [0], [0], [1], [0, 0, 1, 1], [], []>} : vector<128x36xf32>, vector<36x8xf32>, vector<128x8xf32> -> vector<128x8xf32>
    %cst_32 = arith.constant dense<0.000000e+00> : vector<8xf32>
    %42 = vector.multi_reduction <add>, %41, %cst_32 [0] : vector<128x8xf32> to vector<8xf32>
    %43 = vector.shape_cast %42 : vector<8xf32> to vector<1x8xf32>
    %44 = arith.mulf %41, %41 : vector<128x8xf32>
    %cst_33 = arith.constant dense<0.000000e+00> : vector<8xf32>
    %45 = vector.multi_reduction <add>, %44, %cst_33 [0] : vector<128x8xf32> to vector<8xf32>
    %46 = vector.shape_cast %45 : vector<8xf32> to vector<1x8xf32>
    %47 = tpu.concatenate %43, %46 in 0 : vector<1x8xf32>, vector<1x8xf32> -> vector<2x8xf32>
    %c0_34 = arith.constant 0 : index
    %c0_35 = arith.constant 0 : index
    %c0_36 = arith.constant 0 : index
    %c0_37 = arith.constant 0 : index
    %48 = vector.load %arg5[%c0_34, %c0_35, %c0_36, %c0_37] : memref<1x1x2x8xf32, #tpu.memory_space<vmem>>, vector<1x1x2x8xf32>
    %49 = vector.shape_cast %48 : vector<1x1x2x8xf32> to vector<2x8xf32>
    %50 = vector.shape_cast %47 : vector<2x8xf32> to vector<1x1x2x8xf32>
    tpu.vector_store %arg5[%c0_34, %c0_35, %c0_36, %c0_37], %50 {strides = array<i32>} : memref<1x1x2x8xf32, #tpu.memory_space<vmem>>, vector<1x1x2x8xf32>,
    %51 = tpu.transpose %41, [1, 0] : vector<128x8xf32> -> vector<8x128xf32>
    %c0_38 = arith.constant 0 : index
    %c0_39 = arith.constant 0 : index
    %c0_40 = arith.constant 0 : index
    %52 = vector.load %arg4[%c0_38, %c0_39, %c0_40] : memref<1x8x128xf32, #tpu.memory_space<vmem>>, vector<1x8x128xf32>
    %53 = vector.shape_cast %52 : vector<1x8x128xf32> to vector<8x128xf32>
    %54 = vector.shape_cast %51 : vector<8x128xf32> to vector<1x8x128xf32>
    tpu.vector_store %arg4[%c0_38, %c0_39, %c0_40], %54 {strides = array<i32>} : memref<1x8x128xf32, #tpu.memory_space<vmem>>, vector<1x8x128xf32>,
    return
  }
  func.func @transform_0(%arg0: i32, %arg1: i32) -> (i32, i32, i32, i32) {
    %c0_i32 = arith.constant 0 : i32
    %c0_i32_0 = arith.constant 0 : i32
    %c0_i32_1 = arith.constant 0 : i32
    %c0_i32_2 = arith.constant 0 : i32
    return %arg0, %c0_i32, %c0_i32_0, %c0_i32_1 : i32, i32, i32, i32
  }
  func.func @transform_1(%arg0: i32, %arg1: i32) -> (i32, i32) {
    %c0_i32 = arith.constant 0 : i32
    %c0_i32_0 = arith.constant 0 : i32
    %c0_i32_1 = arith.constant 0 : i32
    return %c0_i32, %c0_i32_0 : i32, i32
  }
  func.func @transform_2(%arg0: i32, %arg1: i32) -> (i32, i32, i32) {
    %c0_i32 = arith.constant 0 : i32
    %c0_i32_0 = arith.constant 0 : i32
    return %arg0, %c0_i32, %arg1 : i32, i32, i32
  }
  func.func @transform_3(%arg0: i32, %arg1: i32) -> (i32, i32, i32, i32) {
    %c0_i32 = arith.constant 0 : i32
    %c0_i32_0 = arith.constant 0 : i32
    %c0_i32_1 = arith.constant 0 : i32
    return %arg0, %arg1, %c0_i32, %c0_i32_0 : i32, i32, i32, i32
  }
}

</mosaic_0001>

<bundles_post_ra>
// kernel: tpu_custom_call.1
= control target key start
LH: loop header
LB: loop body
LE: loop exit
PB: predicated region body
PF: predicated region fallthrough
CT: control target
= control target key end

     0   :  { %9 = vsyncpa [#allocation3], 0  ;;  %s2639_s0 = inlined_call_operand.vmem [shape: f32[2,18,18,4], index: 0, kind: input, shape index: {}]   ;;  %s2640_s1 = inlined_call_operand.vmem [shape: f32[36,8], index: 1, kind: input, shape index: {}]   ;;  %s2641_s2 = inlined_call_operand.hbm [shape: f32[2,8,256], index: 2, kind: output, shape index: {0}]   ;;  %s2642_s3 = inlined_call_operand.hbm [shape: f32[2,2,2,8], index: 3, kind: output, shape index: {1}]  }
   0x1   :  { %11 = vsyncpa [#allocation3 + $0x1], 0 }
   0x2   :  { %12 = vsyncpa [#allocation5], 0 }
   0x3   :  { %14 = vsyncpa [#allocation5 + $0x1], 0  ;;  %s1794_s12 = smov 0   ;;  %s1796_s13 = smov 0  }
   0x4   :  { %s1798_s14 = smov 0   ;;  %s1800_s15 = smov 0  }
   0x5   :  { %s1802_s16 = smov 0   ;;  %s1804_s17 = smov 0  }
   0x6   :  { %s1806_s18 = smov 0   ;;  %s1808_s19 = smov 0  }
   0x7 LB: > { %s1403_s20 = sadd.s32 4294967295, %s1764_s19   ;;  %s1404_s21 = sadd.s32 4294967294, %s1764_s19   ;;  %s1764_s19 = sphi %s1808_s19, %s20_s19   ;;  %s1760_s18 = sphi %s1806_s18, %s2654_s18   ;;  %s1756_s17 = sphi %s1804_s17, %s2653_s17   ;;  %s1752_s16 = sphi %s1802_s16, %s2652_s16   ;;  %s1748_s15 = sphi %s1800_s15, %s2651_s15   ;;  %s1744_s14 = sphi %s1798_s14, %s2650_s14   ;;  %s1740_s13 = sphi %s1796_s13, %s2649_s13   ;;  %s1736_s12 = sphi %s1794_s12, %s2648_s12  }
   0x8   : > { %s29_s22 = sadd.s32 1, %s1756_s17  ;;  %s32_s23 = sadd.s32 1, %s1760_s18 }
   0x9   : > { %p30_p0 = scmp.ge.s32.totalorder %s29_s22, 2  ;;  %p98_p1 = scmp.ne.s32.totalorder %s1744_s14, %s1740_s13 }
   0xa   : > { %p99_p2 = scmp.eq.s32.totalorder %s1403_s20, 3  ;;  %p104_p5 = scmp.ne.s32.totalorder %s1740_s13, %s1736_s12 }
   0xb   : > { %s2656_s22 = smov (%p30_p0, %s29_s22), 0  ;;  %s2658_s23 = smov (!%p30_p0, %s32_s23), %s1760_s18 }
   0xc   : > { %s84_s24 = ssub.s32 %s1756_s17, %s2656_s22  ;;  %p1845_p3 = por %p99_p2, %p98_p1 }
   0xd   : > { %p34_p4 = scmp.ge.s32.totalorder %s2658_s23, 2  ;;  %p105_p6 = scmp.eq.s32.totalorder %s1404_s21, 3 }
   0xe   : > { %p1407_p7 = scmp.ge.s32.totalorder %s1764_s19, 1  ;;  %p162_p9 = scmp.lt.s32.totalorder %s1764_s19, 5 }
   0xf   : > { %s2660_s23 = smov (%p34_p4, %s2658_s23), 0  ;;  %p1854_p8 = por %p105_p6, %p104_p5 }
  0x10   : > { %s83_s27 = ssub.s32 %s1760_s18, %s2660_s23  ;;  %s88_s28 = sadd.s32 1, %s1744_s14 }
  0x11   : > { %s85_s29 = sor.u32 %s84_s24, %s83_s27  ;;  %p163_p10 = pnand %p1407_p7, %p162_p9 }
  0x12   : > { %p86_p11 = scmp.eq.s32.totalorder %s85_s29, 0 }
  0x13   : > { %166 = sbr.rel (%p163_p10) target bundleno = 681 (0x2a9), region = 28 }
  0x14   : > { %s1863_s30 = scalar_select %p86_p11, %s1744_s14, %s88_s28  }
  0x18   : > { %p191_p12 = scmp.lt.s32.totalorder %s1752_s16, 1  ;;  %s1412_s5 = smul.u32 192, %s1748_s15  ;;  %vm861_vm0 = vcmask 31744   ;;  %vm878_vm1 = vcmask 64512   ;;  %vm895_vm2 = vcmask 97280   ;;  %vm912_vm3 = vcmask 130048  }
  0x19   : > { %s1766_s11 = smov 4   ;;  %s1767_s20 = smov 8   ;;  %vm1051_vm4 = vcmask 1043456   ;;  %vm946_vm5 = vcmask 195584   ;;  %vm929_vm6 = vcmask 162816   ;;  %vm963_vm7 = vcmask 228352  }
  0x1a   : > { %s192_s4 = scalar_select %p191_p12, %s1752_s16, 1  ;;  %vm980_vm8 = vcmask 261120   ;;  %vm1002_vm9 = vcmask 293888   ;;  %vm1210_vm10 = vcmask 1040384   ;;  %vm1212_vm11 = vcmask 58368  }
  0x1b   : > { %s1768_s21 = smov 12   ;;  %s1769_s24 = smov 16  }
  0x1c   : > { %s1553_s6 = smul.u32 432, %s192_s4  ;;  %s1770_s27 = smov 20  }
  0x1d   : > { %s1771_s28 = smov 32   ;;  %s1772_s29 = smov 28  }
  0x1e   : > { %s195_s9 = scalar_lea.vmem %s2639_s0, %s1553_s6  ;;  %s1773_s4 = smov 24  }
  0x1f   : > { %s1871_s10 = scalar_lea.vmem %s195_s9, %s1412_s5 }
  0x20   : > { %v1874_v0 = vld [vmem:[%s1871_s10 + $0x31] sm:$0xff]  ;;  %v1877_v1 = vld [vmem:[%s1871_s10 + $0x19] sm:$0xff]  ;;  %v215_v2 = vld [vmem:[%s1871_s10 + $0x1] sm:$0xff] }
  0x21   : > { %373 = vrot.lane.b32.xlu2 %v1874_v0, %s1766_s11  ;;  %369 = vrot.lane.b32.xlu1 %v1877_v1, %s1766_s11  ;;  %v1886_v3 = vld [vmem:[%s1871_s10 + $0x39] sm:$0xff]  ;;  %v1889_v4 = vld [vmem:[%s1871_s10 + $0x21] sm:$0xff] }
  0x22   : > { %365 = vrot.lane.b32.xlu0 %v215_v2, %s1766_s11  ;;  %v216_v5 = vld [vmem:[%s1871_s10 + $0x9] sm:$0xff]  ;;  %v1898_v6 = vld [vmem:[%s1871_s10 + $0x61] sm:$0xff]  ;;  %v1901_v7 = vld [vmem:[%s1871_s10 + $0x51] sm:$0xff] }
  0x23   : > { %v1904_v8 = vld [vmem:[%s1871_s10 + $0x49] sm:$0xff]  ;;  %v1913_v9 = vld [vmem:[%s1871_s10 + $0x81] sm:$0xff]  ;;  %v1916_v10 = vld [vmem:[%s1871_s10 + $0x79] sm:$0xff] }
  0x24   : > { %2646 = vst [vmem:[#allocation8_spill] sm:$0xff] %v1913_v9  ;;  %v1919_v11 = vld [vmem:[%s1871_s10 + $0x69] sm:$0xff]  ;;  %v1931_v13 = vld [vmem:[%s1871_s10 + $0x99] sm:$0xff]  ;;  %v1934_v14 = vld [vmem:[%s1871_s10 + $0x91] sm:$0xff] }
  0x25   : > { %v1928_v12 = vld [vmem:[%s1871_s10 + $0xa9] sm:$0xff]  ;;  %v1945_v17 = vld [vmem:[%s1871_s10 + $0xb1] sm:$0xff]  ;;  %v1958_v20 = vld [vmem:[%s1871_s10 + $0x1a] sm:$0xff] }
  0x26   : > { %v232_v15 = vld [vmem:[%s1871_s10 + $0xa] sm:$0xff]  ;;  %v231_v16 = vld [vmem:[%s1871_s10 + $0x2] sm:$0xff]  ;;  %v1952_v18 = vld [vmem:[%s1871_s10 + $0x32] sm:$0xff] }
  0x27   : > { %v1955_v19 = vld [vmem:[%s1871_s10 + $0x22] sm:$0xff]  ;;  %v1967_v21 = vld [vmem:[%s1871_s10 + $0x52] sm:$0xff]  ;;  %v1970_v22 = vld [vmem:[%s1871_s10 + $0x4a] sm:$0xff] }
  0x28   : > { %v1973_v23 = vld [vmem:[%s1871_s10 + $0x3a] sm:$0xff]  ;;  %v1985_v25 = vld [vmem:[%s1871_s10 + $0x6a] sm:$0xff]  ;;  %v1988_v26 = vld [vmem:[%s1871_s10 + $0x62] sm:$0xff] }
  0x29   : > { %375 = vrot.lane.b32.xlu2 %v1886_v3, %s1766_s11  ;;  %371 = vrot.lane.b32.xlu1 %v1889_v4, %s1766_s11  ;;  %v1982_v24 = vld [vmem:[%s1871_s10 + $0x7a] sm:$0xff]  ;;  %v2000_v28 = vld [vmem:[%s1871_s10 + $0x92] sm:$0xff] }
  0x2a   : > { %367 = vrot.lane.b32.xlu0 %v216_v5, %s1766_s11  ;;  %v1997_v27 = vld [vmem:[%s1871_s10 + $0x9a] sm:$0xff]  ;;  %v2003_v29 = vld [vmem:[%s1871_s10 + $0x82] sm:$0xff]  ;;  %v2013_v31 = vld [vmem:[%s1871_s10 + $0xb2] sm:$0xff] }
  0x2b   : > { %v1415_v30 = vld [vmem:[%s1871_s10 + $0x18] sm:$0xff]  ;;  %v2016_v32 = vld [vmem:[%s1871_s10 + $0xaa] sm:$0xff]  ;;  %v1416_v35 = vld [vmem:[%s1871_s10 + $0x20] sm:$0xff] }
  0x2c   : > { %v2024_v33 = vld [vmem:[%s1871_s10 + $0x38] sm:$0xff]  ;;  %v2027_v34 = vld [vmem:[%s1871_s10 + $0x30] sm:$0xff]  ;;  %v2036_v37 = vld [vmem:[%s1871_s10 + $0x60] sm:$0xff] }
  0x2d   : > { %v2039_v38 = vld [vmem:[%s1871_s10 + $0x50] sm:$0xff]  ;;  %v2042_v39 = vld [vmem:[%s1871_s10 + $0x48] sm:$0xff]  ;;  %v2053_v41 = vld [vmem:[%s1871_s10 + $0x80] sm:$0xff] }
  0x2e   : > { %v2056_v42 = vld [vmem:[%s1871_s10 + $0x78] sm:$0xff]  ;;  %v2059_v43 = vld [vmem:[%s1871_s10 + $0x68] sm:$0xff]  ;;  %v2076_v47 = vld [vmem:[%s1871_s10 + $0x90] sm:$0xff] }
  0x2f   : > { %v2070_v45 = vld [vmem:[%s1871_s10 + $0xa8] sm:$0xff]  ;;  %v2073_v46 = vld [vmem:[%s1871_s10 + $0x98] sm:$0xff]  ;;  %v2091_v53 = vld [vmem:[%s1871_s10 + $0xc0] sm:$0xff] }
  0x30   : > { %v2088_v52 = vld [vmem:[%s1871_s10 + $0xc8] sm:$0xff]  ;;  %v2094_v54 = vld [vmem:[%s1871_s10 + $0xb0] sm:$0xff] }
  0x31   : > { %381 = vrot.lane.b32.xlu2 %v1898_v6, %s1766_s11  ;;  %379 = vrot.lane.b32.xlu1 %v1901_v7, %s1766_s11  ;;  %v200_v59 = vld [vmem:[%s1871_s10 + $0x8] sm:$0xff] }
  0x32   : > { %377 = vrot.lane.b32.xlu0 %v1904_v8, %s1766_s11 }
  0x39   : > { %387 = vrot.lane.b32.xlu2 %v1913_v9, %s1766_s11  ;;  %385 = vrot.lane.b32.xlu1 %v1916_v10, %s1766_s11 }
  0x3a   : > { %383 = vrot.lane.b32.xlu0 %v1919_v11, %s1766_s11 }
  0x41   : > { %393 = vrot.lane.b32.xlu2 %v1928_v12, %s1766_s11  ;;  %391 = vrot.lane.b32.xlu1 %v1931_v13, %s1766_s11 }
  0x42   : > { %389 = vrot.lane.b32.xlu0 %v1934_v14, %s1766_s11 }
  0x49   : > { %431 = vrot.lane.b32.xlu2 %v232_v15, %s1767_s20  ;;  %429 = vrot.lane.b32.xlu1 %v231_v16, %s1767_s20 }
  0x4a   : > { %395 = vrot.lane.b32.xlu0 %v1945_v17, %s1766_s11 }
  0x51   : > { %437 = vrot.lane.b32.xlu2 %v1952_v18, %s1767_s20  ;;  %435 = vrot.lane.b32.xlu1 %v1955_v19, %s1767_s20 }
  0x52   : > { %433 = vrot.lane.b32.xlu0 %v1958_v20, %s1767_s20 }
  0x59   : > { %443 = vrot.lane.b32.xlu2 %v1967_v21, %s1767_s20  ;;  %441 = vrot.lane.b32.xlu1 %v1970_v22, %s1767_s20 }
  0x5a   : > { %439 = vrot.lane.b32.xlu0 %v1973_v23, %s1767_s20 }
  0x61   : > { %449 = vrot.lane.b32.xlu2 %v1982_v24, %s1767_s20  ;;  %447 = vrot.lane.b32.xlu1 %v1985_v25, %s1767_s20 }
  0x62   : > { %445 = vrot.lane.b32.xlu0 %v1988_v26, %s1767_s20 }
  0x69   : > { %455 = vrot.lane.b32.xlu2 %v1997_v27, %s1767_s20  ;;  %453 = vrot.lane.b32.xlu1 %v2000_v28, %s1767_s20 }
  0x6a   : > { %451 = vrot.lane.b32.xlu0 %v2003_v29, %s1767_s20 }
  0x71   : > { %493 = vrot.lane.b32.xlu2 %v1415_v30, %s1768_s21  ;;  %459 = vrot.lane.b32.xlu1 %v2013_v31, %s1767_s20 }
  0x72   : > { %457 = vrot.lane.b32.xlu0 %v2016_v32, %s1767_s20 }
  0x79   : > { %499 = vrot.lane.b32.xlu2 %v2024_v33, %s1768_s21  ;;  %497 = vrot.lane.b32.xlu1 %v2027_v34, %s1768_s21 }
  0x7a   : > { %495 = vrot.lane.b32.xlu0 %v1416_v35, %s1768_s21 }
  0x7b   : > { %v374_v36 = vpop.permute.xlu2 %373 }
  0x81   : > { %505 = vrot.lane.b32.xlu2 %v2036_v37, %s1768_s21  ;;  %503 = vrot.lane.b32.xlu1 %v2039_v38, %s1768_s21 }
  0x82   : > { %501 = vrot.lane.b32.xlu0 %v2042_v39, %s1768_s21 }
  0x83   : > { %v2050_v40 = vpop.permute.xlu2 %375 }
  0x89   : > { %511 = vrot.lane.b32.xlu2 %v2053_v41, %s1768_s21  ;;  %509 = vrot.lane.b32.xlu1 %v2056_v42, %s1768_s21 }
  0x8a   : > { %507 = vrot.lane.b32.xlu0 %v2059_v43, %s1768_s21 }
  0x8b   : > { %v2067_v44 = vpop.permute.xlu2 %381 }
  0x91   : > { %517 = vrot.lane.b32.xlu2 %v2070_v45, %s1768_s21  ;;  %515 = vrot.lane.b32.xlu1 %v2073_v46, %s1768_s21 }
  0x92   : > { %513 = vrot.lane.b32.xlu0 %v2076_v47, %s1768_s21 }
  0x93   : > { %v2084_v48 = vpop.permute.xlu2 %387  ;;  %v370_v49 = vpop.permute.xlu1 %369 }
  0x94   : > { %v864_v50 = vsel %vm861_vm0, %v1415_v30, %v370_v49  ;;  %v366_v51 = vpop.permute.xlu0 %365 }
  0x99   : > { %523 = vrot.lane.b32.xlu2 %v2088_v52, %s1768_s21  ;;  %521 = vrot.lane.b32.xlu1 %v2091_v53, %s1768_s21 }
  0x9a   : > { %519 = vrot.lane.b32.xlu0 %v2094_v54, %s1768_s21 }
  0x9b   : > { %v2102_v55 = vpop.permute.xlu2 %393  ;;  %v372_v56 = vpop.permute.xlu1 %371 }
  0x9c   : > { %v865_v57 = vsel %vm861_vm0, %v1416_v35, %v372_v56  ;;  %v368_v58 = vpop.permute.xlu0 %367 }
  0x9d   : > { %v863_v60 = vsel %vm861_vm0, %v200_v59, %v368_v58  ;;  %v199_v58 = vld [vmem:[%s1871_s10] sm:$0xff] }
  0x9e   : > { %v862_v59 = vsel %vm861_vm0, %v199_v58, %v366_v51 }
  0xa1   : > { %561 = vrot.lane.b32.xlu2 %v1874_v0, %s1769_s24  ;;  %559 = vrot.lane.b32.xlu1 %v1889_v4, %s1769_s24 }
  0xa2   : > { %557 = vrot.lane.b32.xlu0 %v1877_v1, %s1769_s24  ;;  %v866_v1 = vsel %vm861_vm0, %v2027_v34, %v374_v36 }
  0xa3   : > { %v432_v61 = vpop.permute.xlu2 %431  ;;  %v380_v62 = vpop.permute.xlu1 %379 }
  0xa4   : > { %v2114_v63 = vsel %vm878_vm1, %v863_v60, %v432_v61  ;;  %v378_v2 = vpop.permute.xlu0 %377  ;;  %v869_v30 = vsel %vm861_vm0, %v2039_v38, %v380_v62 }
  0xa9   : > { %567 = vrot.lane.b32.xlu2 %v1901_v7, %s1769_s24  ;;  %565 = vrot.lane.b32.xlu1 %v1904_v8, %s1769_s24 }
  0xaa   : > { %563 = vrot.lane.b32.xlu0 %v1886_v3, %s1769_s24 }
  0xab   : > { %v438_v4 = vpop.permute.xlu2 %437  ;;  %v386_v5 = vpop.permute.xlu1 %385 }
  0xac   : > { %v2125_v15 = vsel %vm878_vm1, %v866_v1, %v438_v4  ;;  %v384_v16 = vpop.permute.xlu0 %383  ;;  %v872_v60 = vsel %vm861_vm0, %v2056_v42, %v386_v5 }
  0xb1   : > { %573 = vrot.lane.b32.xlu2 %v1916_v10, %s1769_s24  ;;  %571 = vrot.lane.b32.xlu1 %v1919_v11, %s1769_s24 }
  0xb2   : > { %569 = vrot.lane.b32.xlu0 %v1898_v6, %s1769_s24 }
  0xb3   : > { %v444_v35 = vpop.permute.xlu2 %443  ;;  %v392_v36 = vpop.permute.xlu1 %391 }
  0xb4   : > { %v2136_v49 = vsel %vm878_vm1, %v869_v30, %v444_v35  ;;  %v390_v56 = vpop.permute.xlu0 %389  ;;  %v2153_v35 = vld [vmem:[%s1871_s10 + $0xc1] sm:$0xff]  ;;  %v875_v51 = vsel %vm861_vm0, %v2073_v46, %v392_v36  ;;  %v868_v36 = vsel %vm861_vm0, %v2042_v39, %v378_v2 }
  0xb9   : > { %579 = vrot.lane.b32.xlu2 %v1931_v13, %s1769_s24  ;;  %577 = vrot.lane.b32.xlu1 %v1934_v14, %s1769_s24 }
  0xba   : > { %575 = vrot.lane.b32.xlu0 %v1913_v9, %s1769_s24  ;;  %v2169_v9 = vld [vmem:[%s1871_s10 + $0xc9] sm:$0xff] }
  0xbb   : > { %v450_v61 = vpop.permute.xlu2 %449  ;;  %v430_v62 = vpop.permute.xlu1 %429 }
  0xbc   : > { %v2149_v1 = vsel %vm878_vm1, %v872_v60, %v450_v61  ;;  %v879_v4 = vsel %vm878_vm1, %v862_v59, %v430_v62  ;;  %v396_v30 = vpop.permute.xlu0 %395 }
  0xc1   : > { %585 = vrot.lane.b32.xlu2 %v2153_v35, %s1769_s24  ;;  %583 = vrot.lane.b32.xlu1 %v1945_v17, %s1769_s24 }
  0xc2   : > { %581 = vrot.lane.b32.xlu0 %v1928_v12, %s1769_s24 }
  0xc3   : > { %v456_v5 = vpop.permute.xlu2 %455  ;;  %v436_v58 = vpop.permute.xlu1 %435 }
  0xc4   : > { %v2164_v60 = vsel %vm878_vm1, %v875_v51, %v456_v5  ;;  %v882_v59 = vsel %vm878_vm1, %v865_v57, %v436_v58  ;;  %v434_v61 = vpop.permute.xlu0 %433 }
  0xc5   : > { %v881_v62 = vsel %vm878_vm1, %v864_v50, %v434_v61  ;;  %v867_v50 = vsel %vm861_vm0, %v2024_v33, %v2050_v40  ;;  %v871_v40 = vsel %vm861_vm0, %v2059_v43, %v384_v16  ;;  %v870_v61 = vsel %vm861_vm0, %v2036_v37, %v2067_v44 }
  0xc9   : > { %623 = vrot.lane.b32.xlu2 %v1955_v19, %s1770_s27  ;;  %621 = vrot.lane.b32.xlu1 %v1958_v20, %s1770_s27 }
  0xca   : > { %587 = vrot.lane.b32.xlu0 %v2169_v9, %s1769_s24 }
  0xcb   : > { %v494_v57 = vpop.permute.xlu2 %493  ;;  %v442_v51 = vpop.permute.xlu1 %441 }
  0xcc   : > { %v2183_v5 = vsel %vm895_vm2, %v879_v4, %v494_v57  ;;  %v885_v19 = vsel %vm878_vm1, %v868_v36, %v442_v51  ;;  %v440_v58 = vpop.permute.xlu0 %439 }
  0xcd   : > { %v884_v20 = vsel %vm878_vm1, %v867_v50, %v440_v58 }
  0xd1   : > { %813 = vrot.lane.b32.xlu2 %v1952_v18, %s1771_s28  ;;  %749 = vrot.lane.b32.xlu1 %v1874_v0, %s1772_s29 }
  0xd2   : > { %685 = vrot.lane.b32.xlu0 %v2027_v34, %s1773_s4  ;;  %v874_v34 = vsel %vm861_vm0, %v2076_v47, %v390_v56 }
  0xd3   : > { %v500_v2 = vpop.permute.xlu2 %499  ;;  %v448_v4 = vpop.permute.xlu1 %447 }
  0xd4   : > { %v2199_v36 = vsel %vm895_vm2, %v882_v59, %v500_v2  ;;  %v888_v57 = vsel %vm878_vm1, %v871_v40, %v448_v4  ;;  %v446_v51 = vpop.permute.xlu0 %445  ;;  %v873_v59 = vsel %vm861_vm0, %v2053_v41, %v2084_v48 }
  0xd5   : > { %v887_v0 = vsel %vm878_vm1, %v870_v61, %v446_v51 }
  0xd9   : > { %815 = vrot.lane.b32.xlu2 %v1973_v23, %s1771_s28  ;;  %751 = vrot.lane.b32.xlu1 %v1886_v3, %s1772_s29 }
  0xda   : > { %687 = vrot.lane.b32.xlu0 %v2024_v33, %s1773_s4  ;;  %v877_v33 = vsel %vm861_vm0, %v2094_v54, %v396_v30 }
  0xdb   : > { %v506_v44 = vpop.permute.xlu2 %505  ;;  %v454_v16 = vpop.permute.xlu1 %453 }
  0xdc   : > { %v2215_v50 = vsel %vm895_vm2, %v885_v19, %v506_v44  ;;  %v891_v58 = vsel %vm878_vm1, %v874_v34, %v454_v16  ;;  %v452_v40 = vpop.permute.xlu0 %451  ;;  %v876_v19 = vsel %vm861_vm0, %v2070_v45, %v2102_v55 }
  0xdd   : > { %v890_v3 = vsel %vm878_vm1, %v873_v59, %v452_v40 }
  0xe1   : > { %757 = vrot.lane.b32.xlu2 %v1898_v6, %s1772_s29  ;;  %693 = vrot.lane.b32.xlu1 %v2036_v37, %s1773_s4 }
  0xe2   : > { %629 = vrot.lane.b32.xlu0 %v1970_v22, %s1770_s27 }
  0xe3   : > { %v512_v48 = vpop.permute.xlu2 %511  ;;  %v460_v56 = vpop.permute.xlu1 %459 }
  0xe4   : > { %v2231_v2 = vsel %vm895_vm2, %v888_v57, %v512_v48  ;;  %v894_v6 = vsel %vm878_vm1, %v877_v33, %v460_v56  ;;  %v458_v4 = vpop.permute.xlu0 %457 }
  0xe5   : > { %v893_v37 = vsel %vm878_vm1, %v876_v19, %v458_v4 }
  0xe9   : > { %689 = vrot.lane.b32.xlu2 %v2042_v39, %s1773_s4  ;;  %625 = vrot.lane.b32.xlu1 %v1952_v18, %s1770_s27 }
  0xea   : > { %821 = vrot.lane.b32.xlu0 %v1988_v26, %s1771_s28 }
  0xeb   : > { %v518_v30 = vpop.permute.xlu2 %517  ;;  %v498_v61 = vpop.permute.xlu1 %497 }
  0xec   : > { %v2242_v55 = vsel %vm895_vm2, %v891_v58, %v518_v30  ;;  %v898_v57 = vsel %vm895_vm2, %v881_v62, %v498_v61  ;;  %v496_v51 = vpop.permute.xlu0 %495  ;;  %v1001_v30 = vld [vmem:[%s2640_s1 + $0x20] sm:$0xf] }
  0xed   : > { %v2247_v34 = vsel %vm895_vm2, %v2114_v63, %v496_v51  ;;  %1513 = vmatpush.msk.msra.mxu0 %vm1051_vm4, %v1001_v30  ;;  %1538 = vmatpush.msk.msra.mxu1 %vm1051_vm4, %v1001_v30  ;;  %v997_v51 = vld [vmem:[%s2640_s1] sm:$0xff] }
  0xee   : > { %1539 = vmatpush.msk.msra.mxu2 %vm1051_vm4, %v1001_v30  ;;  %1540 = vmatpush.msk.msra.mxu3 %vm1051_vm4, %v1001_v30 }
  0xf1   : > { %701 = vrot.lane.b32.xlu2 %v2076_v47, %s1773_s4  ;;  %753 = vrot.lane.b32.xlu1 %v1904_v8, %s1772_s29 }
  0xf2   : > { %637 = vrot.lane.b32.xlu0 %v1982_v24, %s1770_s27 }
  0xf3   : > { %v524_v18 = vpop.permute.xlu2 %523  ;;  %v504_v39 = vpop.permute.xlu1 %503 }
  0xf4   : > { %v2256_v44 = vsel %vm895_vm2, %v894_v6, %v524_v18  ;;  %v901_v62 = vsel %vm895_vm2, %v884_v20, %v504_v39  ;;  %v502_v16 = vpop.permute.xlu0 %501 }
  0xf5   : > { %v2261_v63 = vsel %vm895_vm2, %v2125_v15, %v502_v16 }
  0xf9   : > { %765 = vrot.lane.b32.xlu2 %v1934_v14, %s1772_s29  ;;  %631 = vrot.lane.b32.xlu1 %v1967_v21, %s1770_s27 }
  0xfa   : > { %817 = vrot.lane.b32.xlu0 %v1970_v22, %s1771_s28 }
  0xfb   : > { %v562_v8 = vpop.permute.xlu2 %561  ;;  %v510_v47 = vpop.permute.xlu1 %509 }
  0xfc   : > { %v2270_v59 = vsel %vm912_vm3, %v898_v57, %v562_v8  ;;  %v904_v20 = vsel %vm895_vm2, %v887_v0, %v510_v47  ;;  %v508_v58 = vpop.permute.xlu0 %507  ;;  %v1509_v8 = vld [vmem:[%s1871_s10 + $0xc2] sm:$0xff] }
  0xfd   : > { %v903_v15 = vsel %vm895_vm2, %v2136_v49, %v508_v58 }
 0x101   : > { %759 = vrot.lane.b32.xlu2 %v1919_v11, %s1772_s29  ;;  %829 = vrot.lane.b32.xlu1 %v2000_v28, %s1771_s28 }
 0x102   : > { %695 = vrot.lane.b32.xlu0 %v2059_v43, %s1773_s4 }
 0x103   : > { %v568_v14 = vpop.permute.xlu2 %567  ;;  %v516_v22 = vpop.permute.xlu1 %515 }
 0x104   : > { %v2282_v40 = vsel %vm912_vm3, %v901_v62, %v568_v14  ;;  %v907_v0 = vsel %vm895_vm2, %v890_v3, %v516_v22  ;;  %v514_v33 = vpop.permute.xlu0 %513 }
 0x105   : > { %v2287_v49 = vsel %vm895_vm2, %v2149_v1, %v514_v33 }
 0x109   : > { %691 = vrot.lane.b32.xlu2 %v2039_v38, %s1773_s4  ;;  %627 = vrot.lane.b32.xlu1 %v1973_v23, %s1770_s27 }
 0x10a   : > { %823 = vrot.lane.b32.xlu0 %v1985_v25, %s1771_s28 }
 0x10b   : > { %v574_v11 = vpop.permute.xlu2 %573  ;;  %v522_v43 = vpop.permute.xlu1 %521 }
 0x10c   : > { %v2296_v48 = vsel %vm912_vm3, %v904_v20, %v574_v11  ;;  %v910_v3 = vsel %vm895_vm2, %v893_v37, %v522_v43  ;;  %v520_v56 = vpop.permute.xlu0 %519 }
 0x10d   : > { %v2301_v1 = vsel %vm895_vm2, %v2164_v60, %v520_v56 }
 0x111   : > { %703 = vrot.lane.b32.xlu2 %v2073_v46, %s1773_s4  ;;  %755 = vrot.lane.b32.xlu1 %v1901_v7, %s1772_s29 }
 0x112   : > { %639 = vrot.lane.b32.xlu0 %v2003_v29, %s1770_s27 }
 0x113   : > { %v580_v23 = vpop.permute.xlu2 %579  ;;  %v2309_v38 = vpop.permute.xlu1 %559 }
 0x114   : > { %v2312_v19 = vsel %vm912_vm3, %v907_v0, %v580_v23  ;;  %v2314_v6 = vpop.permute.xlu0 %557  ;;  %v914_v22 = vsel %vm912_vm3, %v2247_v34, %v2309_v38 }
 0x119   : > { %645 = vrot.lane.b32.xlu2 %v2016_v32, %s1770_s27  ;;  %633 = vrot.lane.b32.xlu1 %v1988_v26, %s1770_s27  ;;  %v999_v26 = vld [vmem:[%s2640_s1 + $0x10] sm:$0xff] }
 0x11a   : > { %819 = vrot.lane.b32.xlu0 %v1967_v21, %s1771_s28  ;;  %v1000_v21 = vld [vmem:[%s2640_s1 + $0x18] sm:$0xff] }
 0x11b   : > { %v586_v7 = vpop.permute.xlu2 %585  ;;  %v2322_v46 = vpop.permute.xlu1 %565  ;;  %1067 = vmatpush.msra.mxu0 %v1000_v21  ;;  %1541 = vmatpush.msra.mxu1 %v1000_v21 }
 0x11c   : > { %v2325_v60 = vsel %vm912_vm3, %v910_v3, %v586_v7  ;;  %v564_v4 = vpop.permute.xlu0 %563  ;;  %1542 = vmatpush.msra.mxu2 %v1000_v21  ;;  %1543 = vmatpush.msra.mxu3 %v1000_v21  ;;  %v1510_v3 = vld [vmem:[%s1871_s10 + $0xca] sm:$0xff]  ;;  %v1480_v21 = vld [vmem:[%s1871_s10 + $0xe0] sm:$0xff] }
 0x11d   : > { %v2329_v37 = vsel %vm912_vm3, %v2199_v36, %v564_v4  ;;  %1068 = vmatpush.msra.mxu0 %v999_v26  ;;  %1544 = vmatpush.msra.mxu1 %v999_v26  ;;  %v1479_v4 = vld [vmem:[%s1871_s10 + $0xd8] sm:$0xff] }
 0x11e   : > { %1545 = vmatpush.msra.mxu2 %v999_v26  ;;  %1546 = vmatpush.msra.mxu3 %v999_v26  ;;  %v1511_v26 = vld [vmem:[%s1871_s10 + $0xda] sm:$0xff] }
 0x121   : > { %709 = vrot.lane.b32.xlu2 %v2091_v53, %s1773_s4  ;;  %697 = vrot.lane.b32.xlu1 %v2056_v42, %s1773_s4  ;;  %v998_v42 = vld [vmem:[%s2640_s1 + $0x8] sm:$0xff] }
 0x122   : > { %767 = vrot.lane.b32.xlu0 %v1931_v13, %s1772_s29  ;;  %1069 = vmatpush.msra.mxu0 %v998_v42 }
 0x123   : > { %v2346_v36 = vpop.permute.xlu2 %623  ;;  %v572_v61 = vpop.permute.xlu1 %571  ;;  %1547 = vmatpush.msra.mxu1 %v998_v42  ;;  %1548 = vmatpush.msra.mxu2 %v998_v42 }
 0x124   : > { %v2349_v57 = vsel %vm912_vm3, %v903_v15, %v572_v61  ;;  %v570_v53 = vpop.permute.xlu0 %569  ;;  %1070 = vmatpush.msra.mxu0 %v997_v51  ;;  %1549 = vmatpush.msra.mxu3 %v998_v42  ;;  %v931_v33 = vsel %vm929_vm6, %v914_v22, %v2346_v36 }
 0x125   : > { %v2356_v13 = vsel %vm912_vm3, %v2215_v50, %v570_v53  ;;  %1550 = vmatpush.msra.mxu1 %v997_v51  ;;  %1551 = vmatpush.msra.mxu2 %v997_v51 }
 0x126   : > { %1552 = vmatpush.msra.mxu3 %v997_v51 }
 0x129   : > { %773 = vrot.lane.b32.xlu2 %v2153_v35, %s1772_s29  ;;  %761 = vrot.lane.b32.xlu1 %v1916_v10, %s1772_s29 }
 0x12a   : > { %831 = vrot.lane.b32.xlu0 %v1997_v27, %s1771_s28 }
 0x12b   : > { %v814_v50 = vpop.permute.xlu2 %813  ;;  %v578_v18 = vpop.permute.xlu1 %577 }
 0x12c   : > { %v2369_v39 = vsel %vm912_vm3, %v2287_v49, %v578_v18  ;;  %v576_v62 = vpop.permute.xlu0 %575 }
 0x12d   : > { %v2373_v16 = vsel %vm912_vm3, %v2231_v2, %v576_v62  ;;  %v1496_v62 = vld [vmem:[%s1871_s10 + $0xe1] sm:$0xff] }
 0x131   : > { %641 = vrot.lane.b32.xlu2 %v2000_v28, %s1770_s27  ;;  %837 = vrot.lane.b32.xlu1 %v1509_v8, %s1771_s28 }
 0x132   : > { %825 = vrot.lane.b32.xlu0 %v1982_v24, %s1771_s28 }
 0x133   : > { %v816_v10 = vpop.permute.xlu2 %815  ;;  %v584_v35 = vpop.permute.xlu1 %583 }
 0x134   : > { %v2383_v47 = vsel %vm912_vm3, %v2301_v1, %v584_v35  ;;  %v582_v20 = vpop.permute.xlu0 %581  ;;  %v917_v1 = vsel %vm912_vm3, %v2261_v63, %v2322_v46  ;;  %v1495_v46 = vld [vmem:[%s1871_s10 + $0xd9] sm:$0xff] }
 0x135   : > { %v2387_v2 = vsel %vm912_vm3, %v2242_v55, %v582_v20 }
 0x139   : > { %647 = vrot.lane.b32.xlu2 %v2013_v31, %s1770_s27  ;;  %635 = vrot.lane.b32.xlu1 %v1985_v25, %s1770_s27  ;;  %v913_v25 = vsel %vm912_vm3, %v2183_v5, %v2314_v6  ;;  %v2647_v5 = vld [vmem:[#allocation8_spill] sm:$0xff] }
 0x13a   : > { %705 = vrot.lane.b32.xlu0 %v2070_v45, %s1773_s4 }
 0x13b   : > { %v758_v24 = vpop.permute.xlu2 %757  ;;  %v622_v28 = vpop.permute.xlu1 %621 }
 0x13c   : > { %v588_v58 = vpop.permute.xlu0 %587 }
 0x13d   : > { %v2397_v15 = vsel %vm912_vm3, %v2256_v44, %v588_v58  ;;  %v930_v44 = vsel %vm929_vm6, %v913_v25, %v622_v28 }
 0x141   : > { %711 = vrot.lane.b32.xlu2 %v2088_v52, %s1773_s4  ;;  %699 = vrot.lane.b32.xlu1 %v2053_v41, %s1773_s4 }
 0x142   : > { %769 = vrot.lane.b32.xlu0 %v1928_v12, %s1772_s29 }
 0x143   : > { %v690_v45 = vpop.permute.xlu2 %689  ;;  %v750_v55 = vpop.permute.xlu1 %749 }
 0x144   : > { %v686_v14 = vpop.permute.xlu0 %685 }
 0x145   : > { %v947_v52 = vsel %vm946_vm5, %v930_v44, %v686_v14 }
 0x146   : > { %v964_v41 = vsel %vm963_vm7, %v947_v52, %v750_v55 }
 0x147   : > { %v981_v12 = vsel %vm980_vm8, %v964_v41, %v814_v50 }
 0x148   : > { %1514 = vmatmul.msk.f32.vlgmr.msra.gmra.mxu0 %vm1002_vm9, %v981_v12 }
 0x149   : > { %775 = vrot.lane.b32.xlu2 %v2169_v9, %s1772_s29  ;;  %763 = vrot.lane.b32.xlu1 %v2647_v5, %s1772_s29 }
 0x14a   : > { %833 = vrot.lane.b32.xlu0 %v2016_v32, %s1771_s28 }
 0x14b   : > { %v752_v0 = vpop.permute.xlu1 %751  ;;  %v702_v11 = vpop.permute.xlu2 %701 }
 0x14c   : > { %v688_v49 = vpop.permute.xlu0 %687 }
 0x14d   : > { %v948_v43 = vsel %vm946_vm5, %v931_v33, %v688_v49 }
 0x14e   : > { %v965_v9 = vsel %vm963_vm7, %v948_v43, %v752_v0 }
 0x14f   : > { %v982_v56 = vsel %vm980_vm8, %v965_v9, %v816_v10 }
 0x150   : > { %1515 = vmatmul.msk.f32.gmra.mxu0 %vm1002_vm9, %v982_v56 }
 0x151   : > { %643 = vrot.lane.b32.xlu2 %v1997_v27, %s1770_s27  ;;  %839 = vrot.lane.b32.xlu1 %v1510_v3, %s1771_s28 }
 0x152   : > { %827 = vrot.lane.b32.xlu0 %v2003_v29, %s1771_s28 }
 0x153   : > { %v694_v32 = vpop.permute.xlu1 %693  ;;  %v766_v38 = vpop.permute.xlu2 %765 }
 0x154   : > { %v630_v34 = vpop.permute.xlu0 %629 }
 0x155   : > { %v934_v23 = vsel %vm929_vm6, %v917_v1, %v630_v34 }
 0x156   : > { %v951_v6 = vsel %vm946_vm5, %v934_v23, %v694_v32 }
 0x157   : > { %v968_v7 = vsel %vm963_vm7, %v951_v6, %v758_v24 }
 0x159   : > { %649 = vrot.lane.b32.xlu1 %v1509_v8, %s1770_s27  ;;  %771 = vrot.lane.b32.xlu2 %v1945_v17, %s1772_s29 }
 0x15a   : > { %707 = vrot.lane.b32.xlu0 %v2094_v54, %s1773_s4 }
 0x15b   : > { %v626_v27 = vpop.permute.xlu1 %625  ;;  %v760_v30 = vpop.permute.xlu2 %759 }
 0x15c   : > { %v822_v29 = vpop.permute.xlu0 %821  ;;  %v932_v36 = vsel %vm929_vm6, %v2270_v59, %v626_v27  ;;  %v1512_v59 = vld [vmem:[%s1871_s10 + $0xe2] sm:$0xff]  ;;  %s1532_s10 = sshll.u32 %s1752_s16, 1 }
 0x15d   : > { %v985_v63 = vsel %vm980_vm8, %v968_v7, %v822_v29  ;;  %v949_v61 = vsel %vm946_vm5, %v932_v36, %v690_v45 }
 0x15e   : > { %1518 = vmatmul.msk.f32.vlgmr.msra.gmra.mxu1 %vm1002_vm9, %v985_v63 }
 0x161   : > { %835 = vrot.lane.b32.xlu1 %v2013_v31, %s1771_s28  ;;  %777 = vrot.lane.b32.xlu2 %v1495_v46, %s1772_s29 }
 0x162   : > { %713 = vrot.lane.b32.xlu0 %v1479_v4, %s1773_s4 }
 0x163   : > { %v754_v17 = vpop.permute.xlu1 %753  ;;  %v692_v31 = vpop.permute.xlu2 %691 }
 0x164   : > { %v638_v54 = vpop.permute.xlu0 %637  ;;  %v966_v42 = vsel %vm963_vm7, %v949_v61, %v754_v17 }
 0x165   : > { %v938_v50 = vsel %vm929_vm6, %v2296_v48, %v638_v54 }
 0x166   : > { %v955_v8 = vsel %vm946_vm5, %v938_v50, %v702_v11 }
 0x167   : > { %v972_v35 = vsel %vm963_vm7, %v955_v8, %v766_v38 }
 0x169   : > { %651 = vrot.lane.b32.xlu1 %v1510_v3, %s1770_s27  ;;  %715 = vrot.lane.b32.xlu2 %v1480_v21, %s1773_s4  ;;  %s2574_s27 = sadd.s32 %s1748_s15, %s1532_s10  ;;  %s1658_s10 = scalar_lea.hbm %s2642_s3, 8 }
 0x16a   : > { %841 = vrot.lane.b32.xlu0 %v1511_v26, %s1771_s28 }
 0x16b   : > { %v632_v53 = vpop.permute.xlu1 %631  ;;  %v704_v28 = vpop.permute.xlu2 %703 }
 0x16c   : > { %v818_v51 = vpop.permute.xlu0 %817  ;;  %v935_v48 = vsel %vm929_vm6, %v2282_v40, %v632_v53 }
 0x16d   : > { %v983_v18 = vsel %vm980_vm8, %v966_v42, %v818_v51 }
 0x16e   : > { %1516 = vmatmul.msk.f32.gmra.mxu0 %vm1002_vm9, %v983_v18 }
 0x171   : > { %843 = vrot.lane.b32.xlu1 %v1512_v59, %s1771_s28  ;;  %s2577_s28 = sand.u32 1, %s1740_s13  }
 0x172   : > { %779 = vrot.lane.b32.xlu0 %v1496_v62, %s1772_s29  ;;  %s1535_s29 = sshll.u32 %s2574_s27, 1  ;;  %s1409_s4 = sshll.u32 %s2577_s28, 1 }
 0x173   : > { %v830_v10 = vpop.permute.xlu1 %829  ;;  %v646_v14 = vpop.permute.xlu2 %645  ;;  %s1281_s7 = scalar_lea.hbm %s2642_s3, %s1535_s29  ;;  %s190_s15 = scalar_lea.vmem [#allocation4], %s1409_s4 }
 0x174   : > { %v696_v20 = vpop.permute.xlu0 %695  ;;  %v989_v24 = vsel %vm980_vm8, %v972_v35, %v830_v10  ;;  %v942_v38 = vsel %vm929_vm6, %v2387_v2, %v646_v14  ;;  %s1283_s8 = sshll.u32 %s190_s15, 4  ;;  %s1285_s9 = sshll.u32 %s1281_s7, 4  ;;  %s1284_s8 = int_to_ptr.vmem [resolvable:$true] %s1283_s8  ;;  %s1286_s9 = int_to_ptr.hbm [resolvable:$true] %s1285_s9 }
 0x175   : > { %1522 = vmatmul.msk.f32.vlgmr.msra.gmra.mxu2 %vm1002_vm9, %v989_v24  ;;  %v952_v58 = vsel %vm946_vm5, %v935_v48, %v696_v20  ;;  %s1253_s11 = scalar_lea.sflag [#allocation5], %s2577_s28  ;;  %s1652_s20 = sshra.s32 %s1286_s9, 4  ;;  %s1653_s20 = int_to_ptr.hbm [resolvable:$true] %s1652_s20 }
 0x176   : > { %v969_v55 = vsel %vm963_vm7, %v952_v58, %v760_v30  ;;  %s1654_s21 = scalar_lea.hbm %s1653_s20, 2  ;;  %p1659_p2 = scmp.lt.s32.totalorder %s1653_s20, %s2642_s3 }
 0x177   : > { %p1655_p13 = scmp.ne.s32.totalorder %s1653_s20, %s1654_s21  ;;  %p1660_p4 = scmp.lt.s32.totalorder %s1658_s10, %s1654_s21 }
 0x179   : > { %p1656_p0 = pnand %p1655_p13, %p1845_p3  ;;  %p1661_p5 = por %p1660_p4, %p1659_p2 }
 0x17b   : > { %v628_v25 = vpop.permute.xlu1 %627  ;;  %v710_v5 = vpop.permute.xlu2 %709  ;;  %p1657_p1 = pneg %p1656_p0 }
 0x17c   : > { %v824_v45 = vpop.permute.xlu0 %823  ;;  %v933_v12 = vsel %vm929_vm6, %v2329_v37, %v628_v25  ;;  %v959_v6 = vsel %vm946_vm5, %v942_v38, %v710_v5 }
 0x17d   : > { %v986_v44 = vsel %vm980_vm8, %v969_v55, %v824_v45  ;;  %v950_v22 = vsel %vm946_vm5, %v933_v12, %v692_v31  ;;  %p1662_p6 = pnand %p1661_p5, %p1657_p1 }
 0x17e   : > { %1519 = vmatmul.msk.f32.gmra.mxu1 %vm1002_vm9, %v986_v44 }
 0x183   : > { %v756_v52 = vpop.permute.xlu1 %755  ;;  %v774_v11 = vpop.permute.xlu2 %773 }
 0x184   : > { %v640_v41 = vpop.permute.xlu0 %639  ;;  %v967_v0 = vsel %vm963_vm7, %v950_v22, %v756_v52 }
 0x185   : > { %v939_v3 = vsel %vm929_vm6, %v2373_v16, %v640_v41  ;;  %v976_v16 = vsel %vm963_vm7, %v959_v6, %v774_v11 }
 0x186   : > { %v956_v56 = vsel %vm946_vm5, %v939_v3, %v704_v28 }
 0x18b   : > { %v634_v40 = vpop.permute.xlu1 %633  ;;  %v642_v1 = vpop.permute.xlu2 %641 }
 0x18c   : > { %v820_v33 = vpop.permute.xlu0 %819  ;;  %v936_v27 = vsel %vm929_vm6, %v2356_v13, %v634_v40  ;;  %v940_v36 = vsel %vm929_vm6, %v2369_v39, %v642_v1 }
 0x18d   : > { %v984_v49 = vsel %vm980_vm8, %v967_v0, %v820_v33 }
 0x18e   : > { %1517 = vmatmul.msk.f32.gmra.mxu0 %vm1002_vm9, %v984_v49 }
 0x193   : > { %v698_v43 = vpop.permute.xlu1 %697  ;;  %v648_v2 = vpop.permute.xlu2 %647 }
 0x194   : > { %v768_v9 = vpop.permute.xlu0 %767  ;;  %v953_v29 = vsel %vm946_vm5, %v936_v27, %v698_v43  ;;  %v943_v18 = vsel %vm929_vm6, %v2383_v47, %v648_v2 }
 0x195   : > { %v973_v32 = vsel %vm963_vm7, %v956_v56, %v768_v9 }
 0x19b   : > { %v762_v37 = vpop.permute.xlu1 %761  ;;  %v712_v13 = vpop.permute.xlu2 %711 }
 0x19c   : > { %v832_v34 = vpop.permute.xlu0 %831  ;;  %v970_v63 = vsel %vm963_vm7, %v953_v29, %v762_v37  ;;  %v960_v59 = vsel %vm946_vm5, %v943_v18, %v712_v13 }
 0x19d   : > { %v990_v23 = vsel %vm980_vm8, %v973_v32, %v832_v34 }
 0x19e   : > { %1523 = vmatmul.msk.f32.gmra.mxu2 %vm1002_vm9, %v990_v23 }
 0x1a3   : > { %v838_v7 = vpop.permute.xlu1 %837  ;;  %v776_v31 = vpop.permute.xlu2 %775 }
 0x1a4   : > { %v826_v46 = vpop.permute.xlu0 %825  ;;  %v993_v4 = vsel %vm980_vm8, %v976_v16, %v838_v7  ;;  %v977_v39 = vsel %vm963_vm7, %v960_v59, %v776_v31 }
 0x1a5   : > { %v987_v30 = vsel %vm980_vm8, %v970_v63, %v826_v46  ;;  %1526 = vmatmul.msk.f32.vlgmr.msra.gmra.mxu3 %vm1002_vm9, %v993_v4 }
 0x1a6   : > { %1520 = vmatmul.msk.f32.gmra.mxu1 %vm1002_vm9, %v987_v30 }
 0x1ab   : > { %v636_v17 = vpop.permute.xlu1 %635  ;;  %v644_v28 = vpop.permute.xlu2 %643 }
 0x1ac   : > { %v706_v54 = vpop.permute.xlu0 %705  ;;  %v937_v62 = vsel %vm929_vm6, %v2349_v57, %v636_v17  ;;  %v941_v41 = vsel %vm929_vm6, %v2312_v19, %v644_v28 }
 0x1ad   : > { %v957_v61 = vsel %vm946_vm5, %v940_v36, %v706_v54 }
 0x1b3   : > { %v700_v21 = vpop.permute.xlu1 %699  ;;  %v772_v45 = vpop.permute.xlu2 %771 }
 0x1b4   : > { %v770_v26 = vpop.permute.xlu0 %769  ;;  %v954_v8 = vsel %vm946_vm5, %v937_v62, %v700_v21 }
 0x1b5   : > { %v974_v42 = vsel %vm963_vm7, %v957_v61, %v770_v26 }
 0x1bb   : > { %v764_v53 = vpop.permute.xlu1 %763  ;;  %v778_v9 = vpop.permute.xlu2 %777 }
 0x1bc   : > { %v834_v51 = vpop.permute.xlu0 %833  ;;  %v971_v35 = vsel %vm963_vm7, %v954_v8, %v764_v53 }
 0x1bd   : > { %v991_v50 = vsel %vm980_vm8, %v974_v42, %v834_v51 }
 0x1be   : > { %1524 = vmatmul.msk.f32.gmra.mxu2 %vm1002_vm9, %v991_v50 }
 0x1c3   : > { %v840_v10 = vpop.permute.xlu1 %839  ;;  %v716_v23 = vpop.permute.xlu2 %715 }
 0x1c4   : > { %v828_v20 = vpop.permute.xlu0 %827  ;;  %v994_v24 = vsel %vm980_vm8, %v977_v39, %v840_v10 }
 0x1c5   : > { %v1072_v48 = vpop.f32.mrf.mxu0  ;;  %v988_v58 = vsel %vm980_vm8, %v971_v35, %v828_v20  ;;  %1527 = vmatmul.msk.f32.gmra.mxu3 %vm1002_vm9, %v994_v24 }
 0x1c6   : > { %1521 = vmatmul.msk.f32.gmra.mxu1 %vm1002_vm9, %v988_v58  ;;  %1214 = vxpose.xlu2.b32.start [1/16] (narrow) %v1072_v48, 8  ;;  %v1157_v47 = vmul.f32 %v1072_v48, %v1072_v48  ;;  %v1120_v44 = vsel %vm878_vm1, %v1072_v48, 0.0 }
 0x1c8   : > { %v1173_v5 = vsel %vm878_vm1, %v1157_v47, 0.0 }
 0x1cb   : > { %v650_v57 = vpop.permute.xlu1 %649 }
 0x1cc   : > { %v708_v25 = vpop.permute.xlu0 %707  ;;  %v944_v19 = vsel %vm929_vm6, %v2325_v60, %v650_v57 }
 0x1cd   : > { %v1075_v55 = vpop.f32.mrf.mxu0  ;;  %v958_v22 = vsel %vm946_vm5, %v941_v41, %v708_v25 }
 0x1ce   : > { %v1121_v14 = vsel %vm878_vm1, %v1075_v55, 0.0  ;;  %v1158_v52 = vmul.f32 %v1075_v55, %v1075_v55  ;;  %1215 = vxpose.xlu2.b32.cont [2/16] (narrow) %v1075_v55, 8  ;;  %v975_v33 = vsel %vm963_vm7, %v958_v22, %v772_v45 }
 0x1cf   : > { %v1122_v12 = vadd.f32 %v1121_v14, %v1120_v44 }
 0x1d0   : > { %v1174_v40 = vsel %vm878_vm1, %v1158_v52, 0.0 }
 0x1d1   : > { %v1175_v0 = vadd.f32 %v1174_v40, %v1173_v5 }
 0x1d3   : > { %v836_v49 = vpop.permute.xlu1 %835 }
 0x1d4   : > { %v714_v11 = vpop.permute.xlu0 %713  ;;  %v992_v43 = vsel %vm980_vm8, %v975_v33, %v836_v49 }
 0x1d5   : > { %1525 = vmatmul.msk.f32.gmra.mxu2 %vm1002_vm9, %v992_v43  ;;  %v961_v3 = vsel %vm946_vm5, %v944_v19, %v714_v11 }
 0x1d6   : > { %v978_v37 = vsel %vm963_vm7, %v961_v3, %v778_v9 }
 0x1db   : > { %v652_v56 = vpop.permute.xlu1 %651  ;;  %v1084_v30 = vpop.f32.mrf.mxu1 }
 0x1dc   : > { %v842_v32 = vpop.permute.xlu0 %841  ;;  %v945_v1 = vsel %vm929_vm6, %v2397_v15, %v652_v56  ;;  %v1161_v17 = vmul.f32 %v1084_v30, %v1084_v30  ;;  %v1127_v26 = vsel %vm878_vm1, %v1084_v30, 0.0 }
 0x1dd   : > { %v995_v34 = vsel %vm980_vm8, %v978_v37, %v842_v32  ;;  %v962_v6 = vsel %vm946_vm5, %v945_v1, %v716_v23 }
 0x1de   : > { %1528 = vmatmul.msk.f32.gmra.mxu3 %vm1002_vm9, %v995_v34  ;;  %v1180_v53 = vsel %vm878_vm1, %v1161_v17, 0.0 }
 0x1e3   : > { %v844_v38 = vpop.permute.xlu1 %843 }
 0x1e4   : > { %v780_v27 = vpop.permute.xlu0 %779 }
 0x1e5   : > { %v979_v60 = vsel %vm963_vm7, %v962_v6, %v780_v27 }
 0x1e6   : > { %v996_v16 = vsel %vm980_vm8, %v979_v60, %v844_v38 }
 0x1e7   : > { %1529 = vmatmul.msk.f32.gmra.mxu3 %vm1002_vm9, %v996_v16 }
 0x1eb   : > { %v1078_v29 = vpop.f32.mrf.mxu0 }
 0x1ec   : > { %v1123_v7 = vsel %vm878_vm1, %v1078_v29, 0.0  ;;  %v1159_v63 = vmul.f32 %v1078_v29, %v1078_v29  ;;  %1216 = vxpose.xlu2.b32.cont [3/16] (narrow) %v1078_v29, 8 }
 0x1ed   : > { %v1124_v46 = vadd.f32 %v1123_v7, %v1122_v12 }
 0x1ee   : > { %v1176_v4 = vsel %vm878_vm1, %v1159_v63, 0.0 }
 0x1ef   : > { %v1177_v15 = vadd.f32 %v1176_v4, %v1175_v0 }
 0x1f8   : > { %v1096_v18 = vpop.f32.mrf.mxu2 }
 0x1f9   : > { %v1165_v52 = vmul.f32 %v1096_v18, %v1096_v18  ;;  %v1135_v12 = vsel %vm878_vm1, %v1096_v18, 0.0 }
 0x1fb   : > { %v1087_v51 = vpop.f32.mrf.mxu1  ;;  %v1188_v22 = vsel %vm878_vm1, %v1165_v52, 0.0 }
 0x1fc   : > { %v1162_v39 = vmul.f32 %v1087_v51, %v1087_v51  ;;  %v1129_v10 = vsel %vm878_vm1, %v1087_v51, 0.0 }
 0x1fe   : > { %v1182_v28 = vsel %vm878_vm1, %v1162_v39, 0.0 }
 0x20b   : > { %v1081_v2 = vpop.f32.mrf.mxu0 }
 0x20c   : > { %v1125_v54 = vsel %vm878_vm1, %v1081_v2, 0.0  ;;  %v1160_v13 = vmul.f32 %v1081_v2, %v1081_v2  ;;  %1217 = vxpose.xlu2.b32.cont [4/16] (narrow) %v1081_v2, 8 }
 0x20d   : > { %v1126_v21 = vadd.f32 %v1125_v54, %v1124_v46 }
 0x20e   : > { %v1178_v36 = vsel %vm878_vm1, %v1160_v13, 0.0 }
 0x20f   : > { %v1128_v31 = vadd.f32 %v1127_v26, %v1126_v21  ;;  %v1179_v61 = vadd.f32 %v1178_v36, %v1177_v15 }
 0x211   : > { %v1181_v42 = vadd.f32 %v1180_v53, %v1179_v61  ;;  %v1130_v24 = vadd.f32 %v1129_v10, %v1128_v31 }
 0x213   : > { %v1183_v47 = vadd.f32 %v1182_v28, %v1181_v42 }
 0x214   : > { %1218 = vxpose.xlu2.b32.cont [5/16] (narrow) %v1084_v30, 8 }
 0x21c   : > { %1219 = vxpose.xlu2.b32.cont [6/16] (narrow) %v1087_v51, 8 }
 0x221   : > { %v1099_v62 = vpop.f32.mrf.mxu2 }
 0x222   : > { %v1166_v40 = vmul.f32 %v1099_v62, %v1099_v62  ;;  %v1137_v49 = vsel %vm878_vm1, %v1099_v62, 0.0 }
 0x223   : > { %v1090_v50 = vpop.f32.mrf.mxu1 }
 0x224   : > { %1220 = vxpose.xlu2.b32.cont [7/16] (narrow) %v1090_v50, 8  ;;  %v1163_v8 = vmul.f32 %v1090_v50, %v1090_v50  ;;  %v1131_v35 = vsel %vm878_vm1, %v1090_v50, 0.0  ;;  %v1190_v9 = vsel %vm878_vm1, %v1166_v40, 0.0 }
 0x225   : > { %v1132_v57 = vadd.f32 %v1131_v35, %v1130_v24 }
 0x226   : > { %v1184_v48 = vsel %vm878_vm1, %v1163_v8, 0.0 }
 0x227   : > { %v1185_v44 = vadd.f32 %v1184_v48, %v1183_v47 }
 0x228   : > { %v1108_v45 = vpop.f32.mrf.mxu3 }
 0x229   : > { %v1169_v27 = vmul.f32 %v1108_v45, %v1108_v45  ;;  %v1143_v29 = vsel %vm878_vm1, %v1108_v45, 0.0 }
 0x22b   : > { %v1196_v63 = vsel %vm878_vm1, %v1169_v27, 0.0 }
 0x241   : > { %v1102_v25 = vpop.f32.mrf.mxu2 }
 0x242   : > { %v1167_v19 = vmul.f32 %v1102_v25, %v1102_v25  ;;  %v1139_v37 = vsel %vm878_vm1, %v1102_v25, 0.0 }
 0x243   : > { %v1093_v59 = vpop.f32.mrf.mxu1 }
 0x244   : > { %1221 = vxpose.xlu2.b32.cont [8/16] (narrow) %v1093_v59, 8  ;;  %v1164_v20 = vmul.f32 %v1093_v59, %v1093_v59  ;;  %v1133_v58 = vsel %vm878_vm1, %v1093_v59, 0.0  ;;  %v1192_v1 = vsel %vm878_vm1, %v1167_v19, 0.0 }
 0x245   : > { %v1134_v14 = vadd.f32 %v1133_v58, %v1132_v57 }
 0x246   : > { %v1186_v55 = vsel %vm878_vm1, %v1164_v20, 0.0 }
 0x247   : > { %v1187_v41 = vadd.f32 %v1186_v55, %v1185_v44  ;;  %v1136_v5 = vadd.f32 %v1135_v12, %v1134_v14 }
 0x248   : > { %v1111_v11 = vpop.f32.mrf.mxu3 }
 0x249   : > { %v1189_v0 = vadd.f32 %v1188_v22, %v1187_v41  ;;  %v1138_v43 = vadd.f32 %v1137_v49, %v1136_v5  ;;  %v1170_v46 = vmul.f32 %v1111_v11, %v1111_v11  ;;  %v1145_v30 = vsel %vm878_vm1, %v1111_v11, 0.0 }
 0x24b   : > { %v1191_v56 = vadd.f32 %v1190_v9, %v1189_v0  ;;  %v1140_v34 = vadd.f32 %v1139_v37, %v1138_v43  ;;  %v1198_v54 = vsel %vm878_vm1, %v1170_v46, 0.0 }
 0x24c   : > { %1222 = vxpose.xlu2.b32.cont [9/16] (narrow) %v1096_v18, 8 }
 0x24d   : > { %v1193_v6 = vadd.f32 %v1192_v1, %v1191_v56 }
 0x254   : > { %1223 = vxpose.xlu2.b32.cont [10/16] (narrow) %v1099_v62, 8 }
 0x258   : > { %v1105_v33 = vpop.f32.mrf.mxu2 }
 0x259   : > { %v1168_v3 = vmul.f32 %v1105_v33, %v1105_v33  ;;  %v1141_v32 = vsel %vm878_vm1, %v1105_v33, 0.0 }
 0x25a   : > { %v1142_v38 = vadd.f32 %v1141_v32, %v1140_v34 }
 0x25b   : > { %v1194_v23 = vsel %vm878_vm1, %v1168_v3, 0.0 }
 0x25c   : > { %1224 = vxpose.xlu2.b32.cont [11/16] (narrow) %v1102_v25, 8  ;;  %v1195_v16 = vadd.f32 %v1194_v23, %v1193_v6  ;;  %v1144_v7 = vadd.f32 %v1143_v29, %v1142_v38 }
 0x25e   : > { %v1197_v15 = vadd.f32 %v1196_v63, %v1195_v16  ;;  %v1146_v17 = vadd.f32 %v1145_v30, %v1144_v7 }
 0x260   : > { %v1199_v26 = vadd.f32 %v1198_v54, %v1197_v15 }
 0x261   : > { %v1114_v60 = vpop.f32.mrf.mxu3 }
 0x262   : > { %v1171_v4 = vmul.f32 %v1114_v60, %v1114_v60  ;;  %v1147_v2 = vsel %vm878_vm1, %v1114_v60, 0.0 }
 0x263   : > { %v1148_v21 = vadd.f32 %v1147_v2, %v1146_v17 }
 0x264   : > { %1225 = vxpose.xlu2.b32.cont [12/16] (narrow) %v1105_v33, 8  ;;  %v1200_v13 = vsel %vm878_vm1, %v1171_v4, 0.0 }
 0x265   : > { %v1201_v53 = vadd.f32 %v1200_v13, %v1199_v26 }
 0x26a   : > { %v1117_v36 = vpop.f32.mrf.mxu3 }
 0x26b   : > { %v1149_v31 = vsel %vm878_vm1, %v1117_v36, 0.0  ;;  %v1172_v61 = vmul.f32 %v1117_v36, %v1117_v36 }
 0x26c   : > { %v1150_v42 = vadd.f32 %v1149_v31, %v1148_v21  ;;  %1226 = vxpose.xlu2.b32.cont [13/16] (narrow) %v1108_v45, 8 }
 0x26d   : > { %v1202_v51 = vsel %vm878_vm1, %v1172_v61, 0.0 }
 0x26e   : > { %v1151_v50 = vrot.slane %v1150_v42, 4  ;;  %v1203_v18 = vadd.f32 %v1202_v51, %v1201_v53 }
 0x270   : > { %v1152_v59 = vadd.f32 %v1151_v50, %v1150_v42  ;;  %v1204_v62 = vrot.slane %v1203_v18, 4 }
 0x272   : > { %v1153_v39 = vrot.slane %v1152_v59, 2  ;;  %v1205_v8 = vadd.f32 %v1204_v62, %v1203_v18 }
 0x274   : > { %v1154_v10 = vadd.f32 %v1153_v39, %v1152_v59  ;;  %v1206_v35 = vrot.slane %v1205_v8, 2  ;;  %1227 = vxpose.xlu2.b32.cont [14/16] (narrow) %v1111_v11, 8 }
 0x276   : > { %v1155_v20 = vrot.slane %v1154_v10, 1  ;;  %v1207_v24 = vadd.f32 %v1206_v35, %v1205_v8 }
 0x278   : > { %v1208_v28 = vrot.slane %v1207_v24, 1  ;;  %v1156_v48 = vadd.f32 %v1155_v20, %v1154_v10 }
 0x27a   : > { %v1209_v58 = vadd.f32 %v1208_v28, %v1207_v24 }
 0x27c   : > { %1228 = vxpose.xlu2.b32.cont [15/16] (narrow) %v1114_v60, 8  ;;  %v1211_v57 = vsel %vm1210_vm10, %v1156_v48, %v1209_v58 }
 0x27d   : > { %1213 = vst.msk [vmem:[%s190_s15] sm:$0x3] %vm1212_vm11, %v1211_v57 }
 0x27e   : > { %1665 = shalt.err (!%p1662_p6)
}
 0x27f   : > { %1555 = dma.vmem_to_hbm [thread:$0]  (%p1845_p3), %s1284_s8, 32, %s1286_s9, %s1253_s11  }
 0x280   : > { %s1408_s16 = sshll.u32 %s2577_s28, 3  ;;  %s1533_s6 = sshll.u32 %s2574_s27, 3 }
 0x281   : > { %s1265_s24 = scalar_lea.hbm %s2641_s2, %s1533_s6  ;;  %s183_s5 = scalar_lea.vmem [#allocation2], %s1408_s16 }
 0x282   : > { %s1267_s20 = sshll.u32 %s183_s5, 4  ;;  %s1269_s21 = sshll.u32 %s1265_s24, 4  ;;  %s1268_s20 = int_to_ptr.vmem [resolvable:$true] %s1267_s20  ;;  %s1270_s21 = int_to_ptr.hbm [resolvable:$true] %s1269_s21 }
 0x283   : > { %s1248_s10 = scalar_lea.sflag [#allocation3], %s2577_s28  ;;  %s1680_s29 = sshra.s32 %s1270_s21, 4  ;;  %s1681_s29 = int_to_ptr.hbm [resolvable:$true] %s1680_s29 }
 0x284   : > { %1229 = vxpose.xlu2.b32.end [16/16] (narrow) %v1117_v36, 8  ;;  %s1682_s4 = scalar_lea.hbm %s1681_s29, 8  ;;  %s1686_s9 = scalar_lea.hbm %s2641_s2, 32 }
 0x285   : > { %p1683_p7 = scmp.ne.s32.totalorder %s1681_s29, %s1682_s4  ;;  %p1687_p11 = scmp.lt.s32.totalorder %s1681_s29, %s2641_s2 }
 0x286   : > { %p1688_p12 = scmp.lt.s32.totalorder %s1686_s9, %s1682_s4 }
 0x287   : > { %p1684_p9 = pnand %p1683_p7, %p1845_p3 }
 0x288   : > { %p1689_p13 = por %p1688_p12, %p1687_p11 }
 0x289   : > { %p1685_p10 = pneg %p1684_p9 }
 0x28b   : > { %p1690_p0 = pnand %p1689_p13, %p1685_p10 }
 0x2a5   : > { %v1230_v47 = vpop.trf.xlu2 }
 0x2a6   : > { %1246 = vst [vmem:[%s183_s5] sm:$0xff] %v1230_v47 }
 0x2a7   : > { %1693 = shalt.err (!%p1690_p0)
}
 0x2a8   : > { %1554 = dma.vmem_to_hbm [thread:$0]  (%p1845_p3), %s1268_s20, 128, %s1270_s21, %s1248_s10  }
 0x2a9 PF: > { %p1565_p1 = scmp.ge.s32.totalorder %s1764_s19, 2  ;;  %s1297_s28 = sand.u32 1, %s1736_s12  }
 0x2aa   : > { %s1298_s6 = scalar_lea.sflag [#allocation3], %s1297_s28 }
 0x2ab   : > { %p1559_p2 = pnand %p1565_p1, %p1854_p8 }
 0x2ad   : > { %p1560_p4 = pneg %p1559_p2 }
 0x2af   : > { %1727 = dma.done.wait (%p1560_p4), %s1298_s6, 128  }
 0x2b0   : > { %1729 = vsyncadd (%p1560_p4), %s1298_s6, 4294967168  ;;  %s1308_s7 = scalar_lea.sflag [#allocation5], %s1297_s28 }
 0x2b1   : > { %1731 = dma.done.wait (%p1560_p4), %s1308_s7, 32  }
 0x2b2   : > { %1733 = vsyncadd (%p1560_p4), %s1308_s7, 4294967264  ;;  %s20_s19 = sadd.s32 1, %s1764_s19   ;;  %s2648_s12 = smov %s1740_s13 }
 0x2b3   : > { %p17_p5 = scmp.ge.s32.totalorder %s20_s19, 6   ;;  %s2649_s13 = smov %s1744_s14 }
 0x2b4   : > { %s2650_s14 = smov %s1863_s30  ;;  %s2651_s15 = smov %s1756_s17 }
 0x2b5   : > { %s2652_s16 = smov %s1760_s18  ;;  %s2653_s17 = smov %s2656_s22 }
 0x2b6   : > { %s2654_s18 = smov %s2660_s23  ;;  %19 = sbr.rel (!%p17_p5) target bundleno = 7 (0x7), region = 83 }
 0x2bb   :  { %1314 = vsyncpa [#allocation3], 1 }
 0x2bc   :  { %1316 = vsyncpa [#allocation3 + $0x1], 1 }
 0x2bd   :  { %1317 = vsyncpa [#allocation5], 1 }
 0x2be   :  { %1319 = vsyncpa [#allocation5 + $0x1], 1 }

</bundles_post_ra>
